<compile_context>
chip_gen: v6e
topology: v6e:2x2x1
jax: 0.10.0
libtpu: 0.0.40
codegen_flags: <defaults>
</compile_context>

<pallas_src>
import functools

import jax
import jax.numpy as jnp
from jax.experimental import pallas as pl
from jax.experimental.pallas import tpu as pltpu


def _round_up(x: int, m: int) -> int:
    return ((x + m - 1) // m) * m


def _choose_batch_tile(B: int, batch_tile: int, align: int = 128) -> int:
    """Pick an MXU-aligned batch tile.

    Guarantees >= 2 grid steps whenever B allows it (so v7x's two TensorCores
    both get work with dimension_semantics=("parallel",)), keeps the tile a
    multiple of 128 for MXU-friendly M tiles, and never emits a block taller
    than the array for small batches.
    """
    if B <= 8:
        return B                        # full-dim block (exempt from 8-row rule)
    if B <= align:
        return max(8, (B // 8) * 8)     # 1-2 steps, block never exceeds the array
    # Cap the tile at ceil(B/2) rounded up to `align` -> at least 2 grid steps.
    half = _round_up(-(-B // 2), align)
    tile = min(batch_tile, half)
    if tile >= align:
        tile = (tile // align) * align
    else:
        tile = max(8, (tile // 8) * 8)
    return tile


def _decoder_kernel(y_ref, w3_ref, b3_ref, w4_ref, b4_ref, o_ref, *,
                    matmul_dtype, approx_sigmoid):
    # ---- Linear 1 (+ ReLU) -------------------------------------------------
    lhs = y_ref[...]
    w3 = w3_ref[...]
    tgt1 = matmul_dtype if matmul_dtype is not None else w3.dtype
    if lhs.dtype != tgt1:
        lhs = lhs.astype(tgt1)
    if w3.dtype != tgt1:                 # statically false when weights pre-cast
        w3 = w3.astype(tgt1)
    h = jnp.dot(lhs, w3, preferred_element_type=jnp.float32)     # (tb, F) f32
    b3 = b3_ref[...]
    if b3.dtype != jnp.float32:
        b3 = b3.astype(jnp.float32)
    h = jnp.maximum(h + b3, 0.0)                                 # f32 VPU math

    # ---- Linear 2 (+ Sigmoid) ----------------------------------------------
    w4 = w4_ref[...]
    tgt2 = matmul_dtype if matmul_dtype is not None else w4.dtype
    lhs2 = h.astype(tgt2) if h.dtype != tgt2 else h
    if w4.dtype != tgt2:                 # statically false when weights pre-cast
        w4 = w4.astype(tgt2)
    z = jnp.dot(lhs2, w4, preferred_element_type=jnp.float32)    # (tb, F) f32
    b4 = b4_ref[...]
    if b4.dtype != jnp.float32:
        b4 = b4.astype(jnp.float32)
    z = z + b4
    if approx_sigmoid:
        # exp already uses the EUP; push the reciprocal there too (VPU stays free).
        s = pl.reciprocal(1.0 + jnp.exp(-z), approx=True)
    else:
        s = jax.nn.sigmoid(z)
    o_ref[...] = s.astype(o_ref.dtype)


def nn_decoder_t_forward(y, w3_t, b3, w4_t, b4, *, batch_tile=1024,
                         matmul_dtype=jnp.bfloat16, out_dtype=None,
                         approx_sigmoid=None):
    """Fused decoder forward.

    y: (B, L); w3_t: (L, F); b3: (1, F); w4_t: (F, F); b4: (1, F) -> (B, F)

    batch_tile:    upper bound on rows per grid step (default 1024; the actual
                   tile is MXU-aligned and capped so the grid has >= 2 steps).
    matmul_dtype:  dtype fed to the MXU (default bf16 with f32 accumulation —
                   recommended on v5e/v6e/v7x).  None => pure-f32 matmuls.
    out_dtype:     output dtype (default: y.dtype).  bf16 halves the dominant
                   HBM write traffic if the consumer tolerates it.
    approx_sigmoid: use the EUP approx reciprocal in the sigmoid.  Default:
                   enabled iff matmul_dtype is set (the fast path).
    """
    B, L = y.shape
    F = w3_t.shape[1]
    out_dtype = y.dtype if out_dtype is None else out_dtype
    if approx_sigmoid is None:
        approx_sigmoid = matmul_dtype is not None

    # Pre-cast the (tiny) weights once in the wrapper so the VMEM-resident
    # copies are already in matmul dtype -> no per-grid-step casts, half the
    # one-time weight DMA.  Biases stay f32 (added to the f32 accumulator).
    if matmul_dtype is not None:
        if w3_t.dtype != matmul_dtype:
            w3_t = w3_t.astype(matmul_dtype)
        if w4_t.dtype != matmul_dtype:
            w4_t = w4_t.astype(matmul_dtype)

    tile = _choose_batch_tile(B, batch_tile)
    grid = (pl.cdiv(B, tile),)   # partial last block is masked by Pallas.

    # Scoped-VMEM estimate: streamed y/out (double-buffered) + resident params
    # + f32 temporaries.  Only raise the limit when it would trip v5e's 16 MiB
    # default (very large user tiles).
    w_itemsize = jnp.dtype(w3_t.dtype).itemsize
    vmem_est = (2 * tile * L * jnp.dtype(y.dtype).itemsize
                + 2 * tile * F * jnp.dtype(out_dtype).itemsize
                + (L * F + F * F) * w_itemsize + 2 * F * 4
                + 4 * tile * F * 4)
    vmem_limit = None
    if vmem_est > 12 * 1024 * 1024:
        vmem_limit = min(2 * vmem_est, 56 * 1024 * 1024)

    kernel = functools.partial(_decoder_kernel, matmul_dtype=matmul_dtype,
                               approx_sigmoid=approx_sigmoid)

    # Weights/biases: whole-array, VMEM-resident (loaded once, not re-DMA'd
    # per grid step).
    resident = pl.BlockSpec(memory_space=pltpu.MemorySpace.VMEM)

    out = pl.pallas_call(
        kernel,
        out_shape=jax.ShapeDtypeStruct((B, F), out_dtype),
        grid_spec=pltpu.PrefetchScalarGridSpec(
            num_scalar_prefetch=0,
            grid=grid,
            in_specs=[
                pl.BlockSpec((tile, L), lambda i: (i, 0)),   # y tile (pipelined)
                resident,                                    # W3^T
                resident,                                    # b3
                resident,                                    # W4^T
                resident,                                    # b4
            ],
            out_specs=pl.BlockSpec((tile, F), lambda i: (i, 0)),
        ),
        compiler_params=pltpu.CompilerParams(
            dimension_semantics=("parallel",),   # batch tiles shard across TCs
            vmem_limit_bytes=vmem_limit),
    )(y, w3_t, b3, w4_t, b4)
    return out


def _ref_forward(y, w3_t, b3, w4_t, b4):
    h = jnp.maximum(y @ w3_t + b3, 0.0)
    return jax.nn.sigmoid(h @ w4_t + b4)


if __name__ == "__main__":
    # Small shapes consistent with the module's forward.  batch=200 is NOT a
    # multiple of 128 -> exercises the masked partial last block, and yields a
    # 2-step grid so both v7x TensorCores get work.
    batch = 200
    latent_len = 32
    num_ingre_feature = 128

    key = jax.random.PRNGKey(0)
    k_y, k_w3, k_b3, k_w4, k_b4 = jax.random.split(key, 5)

    # Deterministic synthetic parameters (PyTorch Linear: W (out,in), b (out,));
    # kept pre-transposed to (in, out) for the kernel.
    y = jax.random.normal(k_y, (batch, latent_len), dtype=jnp.float32)
    w3_t = jax.random.normal(k_w3, (latent_len, num_ingre_feature),
                             dtype=jnp.float32) * (1.0 / jnp.sqrt(latent_len))
    b3 = jax.random.normal(k_b3, (1, num_ingre_feature), dtype=jnp.float32) * 0.1
    w4_t = jax.random.normal(k_w4, (num_ingre_feature, num_ingre_feature),
                             dtype=jnp.float32) * (1.0 / jnp.sqrt(num_ingre_feature))
    b4 = jax.random.normal(k_b4, (1, num_ingre_feature), dtype=jnp.float32) * 0.1

    ref = _ref_forward(y, w3_t, b3, w4_t, b4)

    # --- exact f32 path (matmul_dtype=None, exact sigmoid) ---
    out = nn_decoder_t_forward(y, w3_t, b3, w4_t, b4, matmul_dtype=None)
    out = jax.block_until_ready(out)
    assert out.shape == (batch, num_ingre_feature)
    assert jnp.allclose(out, ref, atol=1e-5, rtol=1e-5), "f32 mismatch vs reference"

    # --- default fast path (bf16 matmuls + f32 accumulate + EUP sigmoid) ---
    out_fast = nn_decoder_t_forward(y, w3_t, b3, w4_t, b4)
    out_fast = jax.block_until_ready(out_fast)
    assert out_fast.shape == (batch, num_ingre_feature)
    assert jnp.allclose(out_fast, ref, atol=5e-2), "bf16 fast path diverged"

    # --- bf16 output (halves dominant HBM write traffic) ---
    out_bf16 = nn_decoder_t_forward(y, w3_t, b3, w4_t, b4,
                                    out_dtype=jnp.bfloat16)
    out_bf16 = jax.block_until_ready(out_bf16)
    assert out_bf16.dtype == jnp.bfloat16
    assert jnp.allclose(out_bf16.astype(jnp.float32), ref, atol=5e-2), \
        "bf16-output path diverged"

    # --- tiny-batch edge case (single full-dim block, no masking needed) ---
    out_small = nn_decoder_t_forward(y[:5], w3_t, b3, w4_t, b4,
                                     matmul_dtype=None)
    out_small = jax.block_until_ready(out_small)
    assert out_small.shape == (5, num_ingre_feature)
    assert jnp.allclose(out_small, ref[:5], atol=1e-5, rtol=1e-5), \
        "tiny-batch path mismatch"

    print("KERNEL_OK")
</pallas_src>

<mosaic_0001>
module attributes {stable_mosaic.version = 11 : i64} {
  func.func @_decoder_kernel(%arg0: i32, %arg1: memref<128x32xf32, #tpu.memory_space<vmem>>, %arg2: memref<32x128xf32, #tpu.memory_space<vmem>>, %arg3: memref<1x128xf32, #tpu.memory_space<vmem>>, %arg4: memref<128x128xf32, #tpu.memory_space<vmem>>, %arg5: memref<1x128xf32, #tpu.memory_space<vmem>>, %arg6: memref<128x128xf32, #tpu.memory_space<vmem>>) attributes {dimension_semantics = [#tpu.dimension_semantics<parallel>], iteration_bounds = array<i64: 2>, scalar_prefetch = 0 : i64, scratch_operands = 0 : i64, tpu.core_type = #tpu.core_type<tc>, window_params = [{transform_indices = @transform_0, window_bounds = array<i64: 128, 32>}, {pipeline_mode = #tpu.pipeline_mode<synchronous>, transform_indices = @transform_1, window_bounds = array<i64: 32, 128>}, {pipeline_mode = #tpu.pipeline_mode<synchronous>, transform_indices = @transform_2, window_bounds = array<i64: 1, 128>}, {pipeline_mode = #tpu.pipeline_mode<synchronous>, transform_indices = @transform_3, window_bounds = array<i64: 128, 128>}, {pipeline_mode = #tpu.pipeline_mode<synchronous>, transform_indices = @transform_4, window_bounds = array<i64: 1, 128>}, {transform_indices = @transform_5, window_bounds = array<i64: 128, 128>}]} {
    %c0 = arith.constant 0 : index
    %c0_0 = arith.constant 0 : index
    %0 = vector.load %arg1[%c0, %c0_0] : memref<128x32xf32, #tpu.memory_space<vmem>>, vector<128x32xf32>
    %c0_1 = arith.constant 0 : index
    %c0_2 = arith.constant 0 : index
    %1 = vector.load %arg2[%c0_1, %c0_2] : memref<32x128xf32, #tpu.memory_space<vmem>>, vector<32x128xf32>
    %cst = arith.constant dense<0.000000e+00> : vector<128x128xf32>
    %2 = tpu.matmul %0, %1, %cst {dimension_numbers = #tpu.dot_dimension_numbers<[1], [0], [0], [1], [0, 0, 1, 1], [], []>} : vector<128x32xf32>, vector<32x128xf32>, vector<128x128xf32> -> vector<128x128xf32>
    %c0_3 = arith.constant 0 : index
    %c0_4 = arith.constant 0 : index
    %3 = vector.load %arg3[%c0_3, %c0_4] : memref<1x128xf32, #tpu.memory_space<vmem>>, vector<1x128xf32>
    %4 = vector.broadcast %3 : vector<1x128xf32> to vector<128x128xf32>
    %5 = arith.addf %2, %4 : vector<128x128xf32>
    %cst_5 = arith.constant 0.000000e+00 : f32
    %6 = vector.broadcast %cst_5 : f32 to vector<128x128xf32>
    %7 = arith.maximumf %5, %6 : vector<128x128xf32>
    %c0_6 = arith.constant 0 : index
    %c0_7 = arith.constant 0 : index
    %8 = vector.load %arg4[%c0_6, %c0_7] : memref<128x128xf32, #tpu.memory_space<vmem>>, vector<128x128xf32>
    %cst_8 = arith.constant dense<0.000000e+00> : vector<128x128xf32>
    %9 = tpu.matmul %7, %8, %cst_8 {dimension_numbers = #tpu.dot_dimension_numbers<[1], [0], [0], [1], [0, 0, 1, 1], [], []>} : vector<128x128xf32>, vector<128x128xf32>, vector<128x128xf32> -> vector<128x128xf32>
    %c0_9 = arith.constant 0 : index
    %c0_10 = arith.constant 0 : index
    %10 = vector.load %arg5[%c0_9, %c0_10] : memref<1x128xf32, #tpu.memory_space<vmem>>, vector<1x128xf32>
    %11 = vector.broadcast %10 : vector<1x128xf32> to vector<128x128xf32>
    %12 = arith.addf %9, %11 : vector<128x128xf32>
    %13 = arith.negf %12 : vector<128x128xf32>
    %14 = math.exp %13 : vector<128x128xf32>
    %cst_11 = arith.constant 1.000000e+00 : f32
    %15 = vector.broadcast %cst_11 : f32 to vector<128x128xf32>
    %16 = arith.addf %15, %14 : vector<128x128xf32>
    %17 = arith.divf %15, %16 : vector<128x128xf32>
    %c0_12 = arith.constant 0 : index
    %c0_13 = arith.constant 0 : index
    %18 = vector.load %arg6[%c0_12, %c0_13] : memref<128x128xf32, #tpu.memory_space<vmem>>, vector<128x128xf32>
    tpu.vector_store %arg6[%c0_12, %c0_13], %17 {strides = array<i32>} : memref<128x128xf32, #tpu.memory_space<vmem>>, vector<128x128xf32>,
    return
  }
  func.func @transform_0(%arg0: i32) -> (i32, i32) {
    %c0_i32 = arith.constant 0 : i32
    %c0_i32_0 = arith.constant 0 : i32
    return %arg0, %c0_i32 : i32, i32
  }
  func.func @transform_1(%arg0: i32) -> (i32, i32) {
    %c0_i32 = arith.constant 0 : i32
    %c0_i32_0 = arith.constant 0 : i32
    %c0_i32_1 = arith.constant 0 : i32
    return %c0_i32, %c0_i32_0 : i32, i32
  }
  func.func @transform_2(%arg0: i32) -> (i32, i32) {
    %c0_i32 = arith.constant 0 : i32
    %c0_i32_0 = arith.constant 0 : i32
    %c0_i32_1 = arith.constant 0 : i32
    return %c0_i32, %c0_i32_0 : i32, i32
  }
  func.func @transform_3(%arg0: i32) -> (i32, i32) {
    %c0_i32 = arith.constant 0 : i32
    %c0_i32_0 = arith.constant 0 : i32
    %c0_i32_1 = arith.constant 0 : i32
    return %c0_i32, %c0_i32_0 : i32, i32
  }
  func.func @transform_4(%arg0: i32) -> (i32, i32) {
    %c0_i32 = arith.constant 0 : i32
    %c0_i32_0 = arith.constant 0 : i32
    %c0_i32_1 = arith.constant 0 : i32
    return %c0_i32, %c0_i32_0 : i32, i32
  }
  func.func @transform_5(%arg0: i32) -> (i32, i32) {
    %c0_i32 = arith.constant 0 : i32
    %c0_i32_0 = arith.constant 0 : i32
    return %arg0, %c0_i32 : i32, i32
  }
}

</mosaic_0001>

<bundles_post_ra>
// kernel: tpu_custom_call.1
= control target key start
LH: loop header
LB: loop body
LE: loop exit
PB: predicated region body
PF: predicated region fallthrough
CT: control target
= control target key end

     0   :  { %10 = vsyncpa [#allocation3], 0  ;;  %s1528_s0 = inlined_call_operand.vmem [shape: f32[200,32], index: 0, kind: input, shape index: {}]   ;;  %s1529_s1 = inlined_call_operand.vmem [shape: f32[32,128], index: 1, kind: input, shape index: {}]   ;;  %s1530_s2 = inlined_call_operand.vmem [shape: f32[1,128], index: 2, kind: input, shape index: {}]   ;;  %s1531_s3 = inlined_call_operand.vmem [shape: f32[128,128], index: 3, kind: input, shape index: {}]   ;;  %s1532_s4 = inlined_call_operand.vmem [shape: f32[1,128], index: 4, kind: input, shape index: {}]   ;;  %s1533_s5 = inlined_call_operand.hbm [shape: f32[200,128], index: 5, kind: output, shape index: {}]  }
   0x1   :  { %12 = vsyncpa [#allocation3 + $0x1], 0  ;;  %s1271_s18 = smov 0   ;;  %s1273_s19 = smov 0  }
   0x2   :  { %s1275_s20 = smov 0   ;;  %s1277_s21 = smov 0  }
   0x3 LB: > { %s1292_s22 = sadd.s32 4294967295, %s1236_s21   ;;  %s849_s23 = sadd.s32 4294967294, %s1236_s21   ;;  %s1236_s21 = sphi %s1277_s21, %s1539_s21   ;;  %s1232_s20 = sphi %s1275_s20, %s1538_s20   ;;  %s1228_s19 = sphi %s1273_s19, %s1537_s19   ;;  %s1224_s18 = sphi %s1271_s18, %s1536_s18  }
   0x4   : > { %s1296_s24 = sadd.s32 1, %s1236_s21   ;;  %s135_s25 = sadd.s32 1, %s1232_s20 }
   0x5   : > { %s132_s26 = ssub.s32 %s1236_s21, %s1296_s24  ;;  %p145_p0 = scmp.ne.s32.totalorder %s1232_s20, %s1228_s19 }
   0x6   : > { %p133_p1 = scmp.eq.s32.totalorder %s132_s26, 0  ;;  %p146_p2 = scmp.eq.s32.totalorder %s1292_s22, 1 }
   0x7   : > { %p151_p3 = scmp.ne.s32.totalorder %s1228_s19, %s1224_s18  ;;  %p152_p4 = scmp.eq.s32.totalorder %s849_s23, 1 }
   0x8   : > { %s1307_s27 = scalar_select %p133_p1, %s1232_s20, %s135_s25  }
   0x9   : > { %p1309_p5 = por %p146_p2, %p145_p0  ;;  %p1313_p6 = por %p152_p4, %p151_p3 }
   0xa   : > { %p852_p7 = scmp.ge.s32.totalorder %s1236_s21, 1  ;;  %p199_p8 = scmp.lt.s32.totalorder %s1236_s21, 3 }
   0xc   : > { %p200_p9 = pnand %p852_p7, %p199_p8 }
   0xd   : > { %s1326_s9 = sshll.u32 (!%p200_p9), %s1292_s22, 4  ;;  %s228_s7 = sand.u32 (!%p200_p9), 1, %s1228_s19  }
   0xe   : > { %203 = sbr.rel (%p200_p9) target bundleno = 514 (0x202), region = 40  ;;  %p236_p10 = scmp.lt.s32.totalorder (!%p200_p9), %s1326_s9, 24 }
   0xf   : > { %s853_s12 = sshll.u32 (!%p200_p9), %s228_s7, 7 }
  0x10   : > { %s1448_s13 = scalar_lea.vmem (!%p200_p9), [#allocation2], %s853_s12 }
  0x13   : > { %v269_v0 = vld [vmem:[%s1529_s1 + $0x18] sm:$0xff]  ;;  %v268_v1 = vld [vmem:[%s1529_s1 + $0x10] sm:$0xff]  ;;  %v267_v3 = vld [vmem:[%s1529_s1 + $0x8] sm:$0xff]  ;;  %s237_s14 = scalar_select %p236_p10, %s1326_s9, 24  ;;  %vm277_vm0 = vcmask 261120  }
  0x14   : > { %952 = vmatprep.subr.mxu0 %v269_v0  ;;  %v502_v2 = vld [vmem:[%s1531_s3 + $0x78] sm:$0xff]  ;;  %v501_v4 = vld [vmem:[%s1531_s3 + $0x70] sm:$0xff]  ;;  %v266_v5 = vld [vmem:[%s1529_s1] sm:$0xff]  ;;  %s776_s15 = ssub.s32 (%p1309_p5), 25, %s1326_s9 }
  0x15   : > { %953 = vmatpush3.msra.mxu0 %v269_v0  ;;  %1040 = vmatprep.subr.mxu1 %v502_v2  ;;  %s855_s25 = sshll.u32 %s237_s14, 3  ;;  %v500_v6 = vld [vmem:[%s1531_s3 + $0x68] sm:$0xff]  ;;  %v499_v11 = vld [vmem:[%s1531_s3 + $0x60] sm:$0xff]  ;;  %v498_v14 = vld [vmem:[%s1531_s3 + $0x58] sm:$0xff]  ;;  %s1468_s14 = scalar_lea.sflag [#allocation3], %s228_s7 }
  0x16   : > { %954 = vmatprep.subr.mxu0 %v268_v1  ;;  %1056 = vmatpush3.msra.mxu1 %v502_v2  ;;  %s1348_s8 = scalar_lea.vmem %s1528_s0, %s855_s25  ;;  %v497_v16 = vld [vmem:[%s1531_s3 + $0x50] sm:$0xff]  ;;  %v496_v18 = vld [vmem:[%s1531_s3 + $0x48] sm:$0xff]  ;;  %v495_v20 = vld [vmem:[%s1531_s3 + $0x40] sm:$0xff]  ;;  %p777_p11 = scmp.lt.s32.totalorder (%p1309_p5), %s776_s15, 16 }
  0x17   : > { %955 = vmatpush3.msra.mxu0 %v268_v1  ;;  %1041 = vmatprep.subr.mxu1 %v501_v4  ;;  %v250_v7 = vld [vmem:[%s1348_s8] sm:$0xff]  ;;  %v251_v8 = vld [vmem:[%s1348_s8 + $0x8] sm:$0xff]  ;;  %v252_v9 = vld [vmem:[%s1348_s8 + $0x10] sm:$0xff] }
  0x18   : > { %956 = vmatprep.subr.mxu0 %v267_v3  ;;  %1057 = vmatpush3.msra.mxu1 %v501_v4  ;;  %v253_v10 = vld [vmem:[%s1348_s8 + $0x18] sm:$0xff]  ;;  %v254_v12 = vld [vmem:[%s1348_s8 + $0x20] sm:$0xff]  ;;  %v255_v13 = vld [vmem:[%s1348_s8 + $0x28] sm:$0xff] }
  0x19   : > { %957 = vmatpush3.msra.mxu0 %v267_v3  ;;  %1042 = vmatprep.subr.mxu1 %v500_v6  ;;  %v256_v15 = vld [vmem:[%s1348_s8 + $0x30] sm:$0xff]  ;;  %v257_v17 = vld [vmem:[%s1348_s8 + $0x38] sm:$0xff]  ;;  %v258_v19 = vld [vmem:[%s1348_s8 + $0x40] sm:$0xff] }
  0x1a   : > { %958 = vmatprep.subr.mxu0 %v266_v5  ;;  %1058 = vmatpush3.msra.mxu1 %v500_v6  ;;  %v259_v21 = vld [vmem:[%s1348_s8 + $0x48] sm:$0xff]  ;;  %v494_v22 = vld [vmem:[%s1531_s3 + $0x38] sm:$0xff]  ;;  %v260_v23 = vld [vmem:[%s1348_s8 + $0x50] sm:$0xff] }
  0x1b   : > { %959 = vmatpush3.msra.mxu0 %v266_v5  ;;  %960 = vmatprep.mubr.msk.f32.mxu0 %vm277_vm0, %v250_v7  ;;  %v493_v24 = vld [vmem:[%s1531_s3 + $0x30] sm:$0xff]  ;;  %v261_v25 = vld [vmem:[%s1348_s8 + $0x58] sm:$0xff]  ;;  %v492_v26 = vld [vmem:[%s1531_s3 + $0x28] sm:$0xff] }
  0x1c   : > { %961 = vmatmul.mubr.msk.f32.vlgmr.msra.gmra.mxu0 %vm277_vm0, %v251_v8  ;;  %984 = vmatprep.subr.mxu0 %v502_v2  ;;  %v262_v27 = vld [vmem:[%s1348_s8 + $0x60] sm:$0xff]  ;;  %v263_v29 = vld [vmem:[%s1348_s8 + $0x68] sm:$0xff]  ;;  %v264_v30 = vld [vmem:[%s1348_s8 + $0x70] sm:$0xff] }
  0x1d   : > { %963 = vmatprep.mubr.msk.f32.mxu0 %vm277_vm0, %v252_v9  ;;  %985 = vmatpush3.msra.mxu0 %v502_v2  ;;  %v491_v28 = vld [vmem:[%s1531_s3 + $0x20] sm:$0xff]  ;;  %v265_v31 = vld [vmem:[%s1348_s8 + $0x78] sm:$0xff]  ;;  %v489_v33 = vld [vmem:[%s1531_s3 + $0x10] sm:$0xff] }
  0x1e   : > { %986 = vmatprep.subr.mxu0 %v501_v4  ;;  %1043 = vmatprep.subr.mxu1 %v499_v11  ;;  %v490_v32 = vld [vmem:[%s1531_s3 + $0x18] sm:$0xff]  ;;  %v488_v34 = vld [vmem:[%s1531_s3 + $0x8] sm:$0xff]  ;;  %v487_v35 = vld [vmem:[%s1531_s3] sm:$0xff] }
  0x1f   : > { %987 = vmatpush3.msra.mxu0 %v501_v4  ;;  %1059 = vmatpush3.msra.mxu1 %v499_v11  ;;  %v856_v36 = vld [vmem:[%s1530_s2] ss:$0 sm:$0xff] }
  0x20   : > { %964 = vmatmul.mubr.msk.f32.gmra.mxu0 %vm277_vm0, %v253_v10  ;;  %988 = vmatprep.subr.mxu0 %v500_v6 }
  0x21   : > { %966 = vmatprep.mubr.msk.f32.mxu0 %vm277_vm0, %v254_v12  ;;  %989 = vmatpush3.msra.mxu0 %v500_v6 }
  0x22   : > { %990 = vmatprep.subr.mxu0 %v499_v11  ;;  %1044 = vmatprep.subr.mxu1 %v498_v14 }
  0x23   : > { %991 = vmatpush3.msra.mxu0 %v499_v11  ;;  %1060 = vmatpush3.msra.mxu1 %v498_v14 }
  0x24   : > { %967 = vmatmul.mubr.msk.f32.gmra.mxu0 %vm277_vm0, %v255_v13  ;;  %992 = vmatprep.subr.mxu0 %v498_v14 }
  0x25   : > { %969 = vmatprep.mubr.msk.f32.mxu0 %vm277_vm0, %v256_v15  ;;  %993 = vmatpush3.msra.mxu0 %v498_v14 }
  0x26   : > { %994 = vmatprep.subr.mxu0 %v497_v16  ;;  %1045 = vmatprep.subr.mxu1 %v497_v16 }
  0x27   : > { %995 = vmatpush3.msra.mxu0 %v497_v16  ;;  %1061 = vmatpush3.msra.mxu1 %v497_v16 }
  0x28   : > { %970 = vmatmul.mubr.msk.f32.gmra.mxu0 %vm277_vm0, %v257_v17  ;;  %996 = vmatprep.subr.mxu0 %v496_v18 }
  0x29   : > { %972 = vmatprep.mubr.msk.f32.mxu0 %vm277_vm0, %v258_v19  ;;  %997 = vmatpush3.msra.mxu0 %v496_v18 }
  0x2a   : > { %998 = vmatprep.subr.mxu0 %v495_v20  ;;  %1046 = vmatprep.subr.mxu1 %v496_v18 }
  0x2b   : > { %999 = vmatpush3.msra.mxu0 %v495_v20  ;;  %1062 = vmatpush3.msra.mxu1 %v496_v18 }
  0x2c   : > { %973 = vmatmul.mubr.msk.f32.gmra.mxu0 %vm277_vm0, %v259_v21  ;;  %1000 = vmatprep.subr.mxu0 %v494_v22  ;;  %v1428_v21 = vld [vmem:[%s1532_s4] ss:$0 sm:$0xff] }
  0x2d   : > { %975 = vmatprep.mubr.msk.f32.mxu0 %vm277_vm0, %v260_v23  ;;  %1001 = vmatpush3.msra.mxu0 %v494_v22 }
  0x2e   : > { %1002 = vmatprep.subr.mxu0 %v493_v24  ;;  %1047 = vmatprep.subr.mxu1 %v495_v20 }
  0x2f   : > { %1003 = vmatpush3.msra.mxu0 %v493_v24  ;;  %1063 = vmatpush3.msra.mxu1 %v495_v20 }
  0x30   : > { %976 = vmatmul.mubr.msk.f32.gmra.mxu0 %vm277_vm0, %v261_v25  ;;  %1004 = vmatprep.subr.mxu0 %v492_v26 }
  0x31   : > { %978 = vmatprep.mubr.msk.f32.mxu0 %vm277_vm0, %v262_v27  ;;  %1005 = vmatpush3.msra.mxu0 %v492_v26 }
  0x32   : > { %1006 = vmatprep.subr.mxu0 %v491_v28  ;;  %1048 = vmatprep.subr.mxu1 %v494_v22 }
  0x33   : > { %1007 = vmatpush3.msra.mxu0 %v491_v28  ;;  %1064 = vmatpush3.msra.mxu1 %v494_v22 }
  0x34   : > { %979 = vmatmul.mubr.msk.f32.gmra.mxu0 %vm277_vm0, %v263_v29  ;;  %1049 = vmatprep.subr.mxu1 %v493_v24 }
  0x35   : > { %981 = vmatprep.mubr.msk.f32.mxu0 %vm277_vm0, %v264_v30  ;;  %1065 = vmatpush3.msra.mxu1 %v493_v24 }
  0x36   : > { %1050 = vmatprep.subr.mxu1 %v492_v26  ;;  %1008 = vmatprep.subr.mxu0 %v490_v32 }
  0x37   : > { %1066 = vmatpush3.msra.mxu1 %v492_v26  ;;  %1009 = vmatpush3.msra.mxu0 %v490_v32 }
  0x38   : > { %982 = vmatmul.mubr.msk.f32.gmra.mxu0 %vm277_vm0, %v265_v31  ;;  %1051 = vmatprep.subr.mxu1 %v491_v28 }
  0x39   : > { %1067 = vmatpush3.msra.mxu1 %v491_v28  ;;  %1010 = vmatprep.subr.mxu0 %v489_v33 }
  0x3a   : > { %1052 = vmatprep.subr.mxu1 %v490_v32  ;;  %1011 = vmatpush3.msra.mxu0 %v489_v33 }
  0x3b   : > { %1068 = vmatpush3.msra.mxu1 %v490_v32  ;;  %1012 = vmatprep.subr.mxu0 %v488_v34 }
  0x3c   : > { %1053 = vmatprep.subr.mxu1 %v489_v33  ;;  %1013 = vmatpush3.msra.mxu0 %v488_v34 }
  0x3d   : > { %1069 = vmatpush3.msra.mxu1 %v489_v33  ;;  %1014 = vmatprep.subr.mxu0 %v487_v35 }
  0x3e   : > { %1054 = vmatprep.subr.mxu1 %v488_v34  ;;  %1015 = vmatpush3.msra.mxu0 %v487_v35 }
  0x3f   : > { %1070 = vmatpush3.msra.mxu1 %v488_v34 }
  0x40   : > { %1055 = vmatprep.subr.mxu1 %v487_v35 }
  0x41   : > { %1071 = vmatpush3.msra.mxu1 %v487_v35 }
  0xdc   : > { %v962_v37 = vpop.f32.mrf.mxu0 }
  0xdd   : > { %v398_v38 = vadd.f32 %v962_v37, %v856_v36 }
  0xde   : > { %v392_v39 = vpop.f32.mrf.mxu0 }
  0xdf   : > { %v393_v40 = vadd.f32 %v856_v36, %v392_v39  ;;  %v472_v43 = vmax.f32 %v398_v38, 0.0 }
  0xe0   : > { %v965_v41 = vpop.f32.mrf.mxu0 }
  0xe1   : > { %v471_v42 = vmax.f32 %v393_v40, 0.0  ;;  %v408_v44 = vadd.f32 %v965_v41, %v856_v36 }
  0xe2   : > { %v402_v45 = vpop.f32.mrf.mxu0 }
  0xe3   : > { %v403_v46 = vadd.f32 %v856_v36, %v402_v45  ;;  %1016 = vmatprep.mubr.f32.mxu0 %v471_v42  ;;  %v474_v49 = vmax.f32 %v408_v44, 0.0 }
  0xe4   : > { %v968_v47 = vpop.f32.mrf.mxu0  ;;  %1017 = vmatmul.mubr.f32.vlgmr.msra.gmra.mxu0 %v472_v43 }
  0xe5   : > { %v473_v48 = vmax.f32 %v403_v46, 0.0  ;;  %v418_v50 = vadd.f32 %v968_v47, %v856_v36 }
  0xe6   : > { %v412_v51 = vpop.f32.mrf.mxu0 }
  0xe7   : > { %v413_v52 = vadd.f32 %v856_v36, %v412_v51  ;;  %1019 = vmatprep.mubr.f32.mxu0 %v473_v48  ;;  %v476_v55 = vmax.f32 %v418_v50, 0.0 }
  0xe8   : > { %v971_v53 = vpop.f32.mrf.mxu0  ;;  %1020 = vmatmul.mubr.f32.gmra.mxu0 %v474_v49 }
  0xe9   : > { %v475_v54 = vmax.f32 %v413_v52, 0.0  ;;  %v428_v56 = vadd.f32 %v971_v53, %v856_v36 }
  0xea   : > { %v422_v57 = vpop.f32.mrf.mxu0 }
  0xeb   : > { %1022 = vmatprep.mubr.f32.mxu0 %v475_v54  ;;  %v423_v58 = vadd.f32 %v856_v36, %v422_v57  ;;  %v478_v61 = vmax.f32 %v428_v56, 0.0 }
  0xec   : > { %v974_v59 = vpop.f32.mrf.mxu0  ;;  %1023 = vmatmul.mubr.f32.gmra.mxu0 %v476_v55 }
  0xed   : > { %v477_v60 = vmax.f32 %v423_v58, 0.0  ;;  %v438_v62 = vadd.f32 %v974_v59, %v856_v36 }
  0xee   : > { %v432_v63 = vpop.f32.mrf.mxu0 }
  0xef   : > { %v433_v0 = vadd.f32 %v856_v36, %v432_v63  ;;  %1025 = vmatprep.mubr.f32.mxu1 %v477_v60  ;;  %v480_v3 = vmax.f32 %v438_v62, 0.0 }
  0xf0   : > { %v977_v1 = vpop.f32.mrf.mxu0  ;;  %1026 = vmatmul.mubr.f32.vlgmr.msra.gmra.mxu1 %v478_v61 }
  0xf1   : > { %v479_v2 = vmax.f32 %v433_v0, 0.0  ;;  %v448_v4 = vadd.f32 %v977_v1, %v856_v36 }
  0xf2   : > { %v442_v5 = vpop.f32.mrf.mxu0 }
  0xf3   : > { %v443_v6 = vadd.f32 %v856_v36, %v442_v5  ;;  %1028 = vmatprep.mubr.f32.mxu1 %v479_v2  ;;  %v482_v9 = vmax.f32 %v448_v4, 0.0 }
  0xf4   : > { %v980_v7 = vpop.f32.mrf.mxu0  ;;  %1029 = vmatmul.mubr.f32.gmra.mxu1 %v480_v3 }
  0xf5   : > { %v481_v8 = vmax.f32 %v443_v6, 0.0  ;;  %v458_v10 = vadd.f32 %v980_v7, %v856_v36 }
  0xf6   : > { %v452_v11 = vpop.f32.mrf.mxu0 }
  0xf7   : > { %v453_v12 = vadd.f32 %v856_v36, %v452_v11  ;;  %1031 = vmatprep.mubr.f32.mxu1 %v481_v8  ;;  %v484_v15 = vmax.f32 %v458_v10, 0.0 }
  0xf8   : > { %v983_v13 = vpop.f32.mrf.mxu0  ;;  %1032 = vmatmul.mubr.f32.gmra.mxu1 %v482_v9 }
  0xf9   : > { %v483_v14 = vmax.f32 %v453_v12, 0.0  ;;  %v468_v16 = vadd.f32 %v983_v13, %v856_v36 }
  0xfa   : > { %v462_v17 = vpop.f32.mrf.mxu0 }
  0xfb   : > { %v463_v18 = vadd.f32 %v856_v36, %v462_v17  ;;  %1034 = vmatprep.mubr.f32.mxu1 %v483_v14  ;;  %v486_v20 = vmax.f32 %v468_v16, 0.0 }
  0xfc   : > { %1035 = vmatmul.mubr.f32.gmra.mxu1 %v484_v15 }
  0xfd   : > { %v485_v19 = vmax.f32 %v463_v18, 0.0 }
  0xff   : > { %1037 = vmatprep.mubr.f32.mxu1 %v485_v19 }
 0x100   : > { %1038 = vmatmul.mubr.f32.gmra.mxu1 %v486_v20 }
 0x1a4   : > { %v1018_v22 = vpop.f32.mrf.mxu0 }
 0x1a5   : > { %v582_v23 = vadd.f32 %v1018_v22, %v1428_v21 }
 0x1a6   : > { %v576_v24 = vpop.f32.mrf.mxu0 }
 0x1a7   : > { %v875_v25 = vmul.f32 -1.442695, %v582_v23  ;;  %v577_v26 = vadd.f32 %v1428_v21, %v576_v24 }
 0x1a8   : > { %v1021_v27 = vpop.f32.mrf.mxu0 }
 0x1a9   : > { %1112 = vpow2.f32 %v875_v25  ;;  %v874_v28 = vmul.f32 -1.442695, %v577_v26  ;;  %v592_v29 = vadd.f32 %v1021_v27, %v1428_v21 }
 0x1aa   : > { %v586_v30 = vpop.f32.mrf.mxu0 }
 0x1ab   : > { %1114 = vpow2.f32 %v874_v28  ;;  %v877_v31 = vmul.f32 -1.442695, %v592_v29  ;;  %v587_v32 = vadd.f32 %v1428_v21, %v586_v30 }
 0x1ac   : > { %v1024_v33 = vpop.f32.mrf.mxu0 }
 0x1ad   : > { %1116 = vpow2.f32 %v877_v31  ;;  %v876_v34 = vmul.f32 -1.442695, %v587_v32  ;;  %v602_v35 = vadd.f32 %v1024_v33, %v1428_v21 }
 0x1ae   : > { %v596_v36 = vpop.f32.mrf.mxu0 }
 0x1af   : > { %1118 = vpow2.f32 %v876_v34  ;;  %v879_v37 = vmul.f32 -1.442695, %v602_v35  ;;  %v597_v38 = vadd.f32 %v1428_v21, %v596_v36 }
 0x1b0   : > { %v1027_v39 = vpop.f32.mrf.mxu1 }
 0x1b1   : > { %1120 = vpow2.f32 %v879_v37  ;;  %v878_v40 = vmul.f32 -1.442695, %v597_v38  ;;  %v612_v41 = vadd.f32 %v1027_v39, %v1428_v21 }
 0x1b2   : > { %v606_v42 = vpop.f32.mrf.mxu1 }
 0x1b3   : > { %1122 = vpow2.f32 %v878_v40  ;;  %v881_v43 = vmul.f32 -1.442695, %v612_v41  ;;  %v607_v44 = vadd.f32 %v1428_v21, %v606_v42 }
 0x1b4   : > { %v1030_v45 = vpop.f32.mrf.mxu1 }
 0x1b5   : > { %1124 = vpow2.f32 %v881_v43  ;;  %v880_v46 = vmul.f32 -1.442695, %v607_v44  ;;  %v622_v47 = vadd.f32 %v1030_v45, %v1428_v21 }
 0x1b6   : > { %v1113_v48 = vpop.eup %1112  ;;  %v616_v49 = vpop.f32.mrf.mxu1 }
 0x1b7   : > { %v704_v50 = vadd.f32 1.0, %v1113_v48  ;;  %1126 = vpow2.f32 %v880_v46  ;;  %v883_v51 = vmul.f32 -1.442695, %v622_v47  ;;  %v617_v52 = vadd.f32 %v1428_v21, %v616_v49 }
 0x1b8   : > { %v1115_v53 = vpop.eup %1114  ;;  %v1033_v54 = vpop.f32.mrf.mxu1 }
 0x1b9   : > { %1128 = vrcp.f32 %v704_v50  ;;  %v703_v55 = vadd.f32 1.0, %v1115_v53  ;;  %v882_v56 = vmul.f32 -1.442695, %v617_v52  ;;  %v632_v57 = vadd.f32 %v1033_v54, %v1428_v21 }
 0x1ba   : > { %v1117_v58 = vpop.eup %1116  ;;  %1130 = vpow2.f32 %v883_v51  ;;  %v626_v59 = vpop.f32.mrf.mxu1 }
 0x1bb   : > { %1132 = vrcp.f32 %v703_v55  ;;  %v706_v60 = vadd.f32 1.0, %v1117_v58  ;;  %v885_v61 = vmul.f32 -1.442695, %v632_v57  ;;  %v627_v62 = vadd.f32 %v1428_v21, %v626_v59 }
 0x1bc   : > { %v1119_v63 = vpop.eup %1118  ;;  %1134 = vpow2.f32 %v882_v56  ;;  %v1036_v0 = vpop.f32.mrf.mxu1 }
 0x1bd   : > { %1136 = vrcp.f32 %v706_v60  ;;  %v705_v1 = vadd.f32 1.0, %v1119_v63  ;;  %v884_v2 = vmul.f32 -1.442695, %v627_v62  ;;  %v642_v3 = vadd.f32 %v1036_v0, %v1428_v21 }
 0x1be   : > { %v1121_v4 = vpop.eup %1120  ;;  %1138 = vpow2.f32 %v885_v61  ;;  %v636_v5 = vpop.f32.mrf.mxu1 }
 0x1bf   : > { %1140 = vrcp.f32 %v705_v1  ;;  %v708_v6 = vadd.f32 1.0, %v1121_v4  ;;  %v887_v7 = vmul.f32 -1.442695, %v642_v3  ;;  %v637_v8 = vadd.f32 %v1428_v21, %v636_v5 }
 0x1c0   : > { %v1123_v9 = vpop.eup %1122  ;;  %1142 = vpow2.f32 %v884_v2  ;;  %v1039_v10 = vpop.f32.mrf.mxu1 }
 0x1c1   : > { %1144 = vrcp.f32 %v708_v6  ;;  %v707_v11 = vadd.f32 1.0, %v1123_v9  ;;  %v886_v12 = vmul.f32 -1.442695, %v637_v8  ;;  %v652_v13 = vadd.f32 %v1039_v10, %v1428_v21 }
 0x1c2   : > { %v1125_v14 = vpop.eup %1124  ;;  %1146 = vpow2.f32 %v887_v7  ;;  %v646_v15 = vpop.f32.mrf.mxu1 }
 0x1c3   : > { %1148 = vrcp.f32 %v707_v11  ;;  %v710_v16 = vadd.f32 1.0, %v1125_v14  ;;  %v889_v17 = vmul.f32 -1.442695, %v652_v13  ;;  %v647_v18 = vadd.f32 %v1428_v21, %v646_v15 }
 0x1c4   : > { %v1127_v19 = vpop.eup %1126  ;;  %1150 = vpow2.f32 %v886_v12 }
 0x1c5   : > { %1152 = vrcp.f32 %v710_v16  ;;  %v709_v20 = vadd.f32 1.0, %v1127_v19  ;;  %v888_v22 = vmul.f32 -1.442695, %v647_v18 }
 0x1c6   : > { %v1129_v23 = vpop.eup %1128  ;;  %1154 = vpow2.f32 %v889_v17 }
 0x1c7   : > { %v1131_v24 = vpop.eup %1130  ;;  %752 = vst [vmem:[%s1448_s13 + $0x8] sm:$0xff] %v1129_v23  ;;  %1156 = vrcp.f32 %v709_v20 }
 0x1c8   : > { %v1133_v25 = vpop.eup %1132  ;;  %v712_v26 = vadd.f32 1.0, %v1131_v24  ;;  %1158 = vpow2.f32 %v888_v22 }
 0x1c9   : > { %v1135_v21 = vpop.eup %1134  ;;  %751 = vst [vmem:[%s1448_s13] sm:$0xff] %v1133_v25 }
 0x1ca   : > { %v1137_v27 = vpop.eup %1136  ;;  %1160 = vrcp.f32 %v712_v26  ;;  %v711_v28 = vadd.f32 1.0, %v1135_v21 }
 0x1cb   : > { %v1139_v29 = vpop.eup %1138  ;;  %754 = vst [vmem:[%s1448_s13 + $0x18] sm:$0xff] %v1137_v27 }
 0x1cc   : > { %v1141_v30 = vpop.eup %1140  ;;  %1162 = vrcp.f32 %v711_v28  ;;  %v714_v31 = vadd.f32 1.0, %v1139_v29 }
 0x1cd   : > { %v1143_v32 = vpop.eup %1142  ;;  %753 = vst [vmem:[%s1448_s13 + $0x10] sm:$0xff] %v1141_v30 }
 0x1ce   : > { %v1145_v33 = vpop.eup %1144  ;;  %1164 = vrcp.f32 %v714_v31  ;;  %v713_v34 = vadd.f32 1.0, %v1143_v32 }
 0x1cf   : > { %v1147_v35 = vpop.eup %1146  ;;  %756 = vst [vmem:[%s1448_s13 + $0x28] sm:$0xff] %v1145_v33 }
 0x1d0   : > { %v1149_v36 = vpop.eup %1148  ;;  %1166 = vrcp.f32 %v713_v34  ;;  %v716_v37 = vadd.f32 1.0, %v1147_v35 }
 0x1d1   : > { %v1151_v38 = vpop.eup %1150  ;;  %755 = vst [vmem:[%s1448_s13 + $0x20] sm:$0xff] %v1149_v36 }
 0x1d2   : > { %v1153_v39 = vpop.eup %1152  ;;  %1168 = vrcp.f32 %v716_v37  ;;  %v715_v40 = vadd.f32 1.0, %v1151_v38 }
 0x1d3   : > { %v1155_v41 = vpop.eup %1154  ;;  %758 = vst [vmem:[%s1448_s13 + $0x38] sm:$0xff] %v1153_v39 }
 0x1d4   : > { %v1157_v42 = vpop.eup %1156  ;;  %1170 = vrcp.f32 %v715_v40  ;;  %v718_v43 = vadd.f32 1.0, %v1155_v41 }
 0x1d5   : > { %v1159_v44 = vpop.eup %1158  ;;  %757 = vst [vmem:[%s1448_s13 + $0x30] sm:$0xff] %v1157_v42 }
 0x1d6   : > { %1172 = vrcp.f32 %v718_v43  ;;  %v717_v45 = vadd.f32 1.0, %v1159_v44 }
 0x1d7   : > { %v1161_v46 = vpop.eup %1160 }
 0x1d8   : > { %760 = vst [vmem:[%s1448_s13 + $0x48] sm:$0xff] %v1161_v46  ;;  %1174 = vrcp.f32 %v717_v45 }
 0x1d9   : > { %v1163_v47 = vpop.eup %1162 }
 0x1da   : > { %759 = vst [vmem:[%s1448_s13 + $0x40] sm:$0xff] %v1163_v47 }
 0x1db   : > { %v1165_v48 = vpop.eup %1164 }
 0x1dc   : > { %762 = vst [vmem:[%s1448_s13 + $0x58] sm:$0xff] %v1165_v48 }
 0x1dd   : > { %v1167_v49 = vpop.eup %1166 }
 0x1de   : > { %761 = vst [vmem:[%s1448_s13 + $0x50] sm:$0xff] %v1167_v49 }
 0x1df   : > { %v1169_v50 = vpop.eup %1168 }
 0x1e0   : > { %764 = vst [vmem:[%s1448_s13 + $0x68] sm:$0xff] %v1169_v50 }
 0x1e1   : > { %v1171_v51 = vpop.eup %1170 }
 0x1e2   : > { %763 = vst [vmem:[%s1448_s13 + $0x60] sm:$0xff] %v1171_v51  ;;  %774 = sbr.rel (!%p1309_p5) target bundleno = 514 (0x202), region = 44 }
 0x1e3   : > { %v1173_v52 = vpop.eup %1172 }
 0x1e4   : > { %766 = vst [vmem:[%s1448_s13 + $0x78] sm:$0xff] %v1173_v52 }
 0x1e5   : > { %v1175_v53 = vpop.eup %1174 }
 0x1e6   : > { %765 = vst [vmem:[%s1448_s13 + $0x70] sm:$0xff] %v1175_v53 }
 0x1e7   : > { %s1541_s15 = smov (!%p777_p11, %s776_s15), 16 }
 0x1e8   : > { %s1473_s16 = sshll.u32 %s1541_s15, 7 }
 0x1e9   : > { %s781_s17 = ssub.s32 2048, %s1473_s16 }
 0x1ea   : > { %782 = vsyncadd %s1468_s14, %s781_s17  ;;  %p893_p12 = scmp.ne.s32.totalorder %s1473_s16, 0  ;;  %s899_s8 = sshll.u32 %s1292_s22, 11 }
 0x1eb   : > { %s1482_s25 = scalar_lea.hbm %s1533_s5, %s899_s8  ;;  %s787_s9 = sshll.u32 %s1448_s13, 4  ;;  %s1485_s9 = int_to_ptr.vmem [resolvable:$true] %s787_s9 }
 0x1ec   : > { %s1176_s26 = scalar_lea.vmem %s1485_s9, %s1473_s16  ;;  %s1238_s30 = smov [#allocation2]  }
 0x1ed   : > { %p1177_p13 = scmp.ne.s32.totalorder %s1485_s9, %s1176_s26  ;;  %s1180_s6 = sshll.u32 %s1238_s30, 4  ;;  %s1181_s6 = int_to_ptr.vmem [resolvable:$false] %s1180_s6 }
 0x1ee   : > { %s1182_s22 = scalar_lea.vmem %s1181_s6, 4096  ;;  %p1183_p2 = scmp.lt.s32.totalorder %s1485_s9, %s1181_s6 }
 0x1ef   : > { %p1178_p0 = pnand %p1177_p13, %p893_p12  ;;  %p1184_p3 = scmp.lt.s32.totalorder %s1182_s22, %s1176_s26 }
 0x1f1   : > { %p1179_p1 = pneg %p1178_p0  ;;  %p1185_p4 = por %p1184_p3, %p1183_p2 }
 0x1f3   : > { %p1186_p5 = pnand %p1185_p4, %p1179_p1 }
 0x1f5   : > { %1189 = shalt.err (!%p1186_p5)
}
 0x1f6   : > { %s1190_s7 = scalar_lea.hbm %s1482_s25, %s1473_s16  ;;  %s1194_s12 = scalar_lea.hbm %s1533_s5, 3200 }
 0x1f7   : > { %p1191_p7 = scmp.ne.s32.totalorder %s1482_s25, %s1190_s7  ;;  %p1195_p10 = scmp.lt.s32.totalorder %s1482_s25, %s1533_s5 }
 0x1f8   : > { %p1196_p11 = scmp.lt.s32.totalorder %s1194_s12, %s1190_s7 }
 0x1f9   : > { %p1192_p8 = pnand %p1191_p7, %p893_p12 }
 0x1fa   : > { %p1197_p13 = por %p1196_p11, %p1195_p10 }
 0x1fb   : > { %p1193_p9 = pneg %p1192_p8 }
 0x1fd   : > { %p1198_p0 = pnand %p1197_p13, %p1193_p9 }
 0x1ff   : > { %1201 = shalt.err (!%p1198_p0)
}
 0x200   : > { %s1239_s17 = smov 128   ;;  %s1240_s8 = smov 8  }
 0x201   : > { %793 = dma.vmem_to_hbm [thread:$0]  (%p893_p12), %s1485_s9, %s1473_s16, %s1482_s25, %s1468_s14, %s1239_s17, %s1239_s17, %s1240_s8  }
 0x202 PF: > { %p1077_p1 = scmp.ge.s32.totalorder %s1236_s21, 2  ;;  %s802_s23 = sand.u32 1, %s1224_s18  }
 0x203   : > { %s803_s28 = scalar_lea.sflag [#allocation3], %s802_s23 }
 0x204   : > { %p1074_p2 = pnand %p1077_p1, %p1313_p6 }
 0x206   : > { %p1075_p3 = pneg %p1074_p2 }
 0x208   : > { %1219 = dma.done.wait (%p1075_p3), %s803_s28, 2048  }
 0x209   : > { %1221 = vsyncadd (%p1075_p3), %s803_s28, 4294965248  ;;  %p15_p4 = scmp.ge.s32.totalorder %s1296_s24, 4   ;;  %s1536_s18 = smov %s1228_s19 }
 0x20a   : > { %s1537_s19 = smov %s1232_s20  ;;  %s1538_s20 = smov %s1307_s27 }
 0x20b   : > { %s1539_s21 = smov %s1296_s24  ;;  %17 = sbr.rel (!%p15_p4) target bundleno = 3 (0x3), region = 75 }
 0x210   :  { %808 = vsyncpa [#allocation3], 1 }
 0x211   :  { %810 = vsyncpa [#allocation3 + $0x1], 1 }

</bundles_post_ra>
